<compile_context>
chip_gen: v7x
topology: tpu7x:2x2x1
jax: 0.10.0
libtpu: 0.0.40
codegen_flags: <defaults>
</compile_context>

<pallas_src>
import functools

import jax
import jax.numpy as jnp
from jax.experimental import pallas as pl
from jax.experimental.pallas import tpu as pltpu

_IN_FEATURES = 28 * 28   # 784, hard-coded by the module's x.view(-1, 28*28)
_H1 = 128
_H2 = 64
_LANE = 128              # pad the class dim to a full lane width for dense stores


def _round_up(n, m):
    return (n + m - 1) // m * m


def _mlp_kernel(x_ref, w1_ref, b1_ref, w2_ref, b2_ref, w3_ref, b3_ref, o_ref):
    # x tile: bf16 [TM, 784]; weights bf16 [in, out]; biases f32 [1, out].
    x = x_ref[...]

    h1 = jnp.dot(x, w1_ref[...], preferred_element_type=jnp.float32)
    h1 = jax.nn.sigmoid(h1 + b1_ref[...])            # f32 elementwise (v5e has no bf16 VPU/EUP)
    # nn.Dropout(p) -> identity at inference time.
    h1 = h1.astype(jnp.bfloat16)

    h2 = jnp.dot(h1, w2_ref[...], preferred_element_type=jnp.float32)
    h2 = jax.nn.sigmoid(h2 + b2_ref[...])
    # nn.Dropout(p) -> identity at inference time.
    h2 = h2.astype(jnp.bfloat16)

    out = jnp.dot(h2, w3_ref[...], preferred_element_type=jnp.float32) + b3_ref[...]
    o_ref[...] = out.astype(o_ref.dtype)


@functools.partial(jax.jit, static_argnames=("num_classes", "block_m"))
def digit_classifier_forward(x, params, *, num_classes=10, block_m=512):
    """x: [B, 1, 28, 28] (or anything reshapeable to [-1, 784]). Returns f32 [B, num_classes]."""
    w1, b1, w2, b2, w3, b3 = params          # w*: bf16 [in, out]; b*: f32 [1, out]; w3/b3 lane-padded

    x2d = x.reshape(-1, _IN_FEATURES).astype(jnp.bfloat16)   # same semantics as torch view(-1, 784)
    B = x2d.shape[0]
    c_pad = w3.shape[1]                      # num_classes rounded up to 128

    # Batch tile: multiple of 8 (f32 sublanes), capped at block_m (sweep per generation;
    # 512 fits comfortably under v7x's 64 MiB VMEM with double buffering).
    tm = min(block_m, _round_up(max(B, 1), 8))
    b_pad = _round_up(B, tm)
    if b_pad != B:
        x2d = jnp.pad(x2d, ((0, b_pad - B), (0, 0)))         # zero rows -> zero contribution

    grid = (b_pad // tm,)

    flops = 2 * b_pad * (_IN_FEATURES * _H1 + _H1 * _H2 + _H2 * c_pad)
    bytes_accessed = (
        b_pad * _IN_FEATURES * 2                              # x (bf16)
        + (_IN_FEATURES * _H1 + _H1 * _H2 + _H2 * c_pad) * 2  # weights (bf16)
        + (_H1 + _H2 + c_pad) * 4                             # biases (f32)
        + b_pad * c_pad * 4                                   # output (f32)
    )

    resident = lambda shape: pl.BlockSpec(shape, lambda i: (0, 0))

    out_padded = pl.pallas_call(
        _mlp_kernel,
        out_shape=jax.ShapeDtypeStruct((b_pad, c_pad), jnp.float32),
        grid=grid,
        in_specs=[
            pl.BlockSpec((tm, _IN_FEATURES), lambda i: (i, 0)),   # streamed x tiles
            resident(w1.shape), resident(b1.shape),               # weights stay in VMEM
            resident(w2.shape), resident(b2.shape),
            resident(w3.shape), resident(b3.shape),
        ],
        out_specs=pl.BlockSpec((tm, c_pad), lambda i: (i, 0)),
        compiler_params=pltpu.CompilerParams(
            dimension_semantics=("parallel",),      # shards batch tiles across TCs on v7x
            vmem_limit_bytes=32 << 20,              # weights ~0.25 MiB + double-buffered tiles << 32 MiB
        ),
        cost_estimate=pl.CostEstimate(
            flops=flops,
            transcendentals=b_pad * (_H1 + _H2),    # sigmoid exps
            bytes_accessed=bytes_accessed,
        ),
    )(x2d, w1, b1, w2, b2, w3, b3)

    return out_padded[:B, :num_classes]


def init_params(key, num_features=_IN_FEATURES, num_classes=10):
    """PyTorch-style nn.Linear init; weights stored transposed [in, out] in bf16, biases f32.
    The final layer is zero-padded to 128 output lanes (sliced back in the wrapper)."""
    ks = jax.random.split(key, 6)

    def linear(kw, kb, fan_in, fan_out, pad_out=None):
        bound = 1.0 / jnp.sqrt(fan_in)
        w = jax.random.uniform(kw, (fan_in, fan_out), jnp.float32, -bound, bound)
        b = jax.random.uniform(kb, (1, fan_out), jnp.float32, -bound, bound)
        if pad_out is not None and pad_out > fan_out:
            w = jnp.pad(w, ((0, 0), (0, pad_out - fan_out)))
            b = jnp.pad(b, ((0, 0), (0, pad_out - fan_out)))
        return w.astype(jnp.bfloat16), b.astype(jnp.float32)

    c_pad = _round_up(num_classes, _LANE)
    w1, b1 = linear(ks[0], ks[1], num_features, _H1)
    w2, b2 = linear(ks[2], ks[3], _H1, _H2)
    w3, b3 = linear(ks[4], ks[5], _H2, num_classes, pad_out=c_pad)
    return (w1, b1, w2, b2, w3, b3)


if __name__ == "__main__":
    key = jax.random.PRNGKey(0)
    k_x, k_p = jax.random.split(key)

    # Small batch; spatial dims fixed by the module's hard-coded view(-1, 28*28).
    x = jax.random.normal(k_x, (2, 1, 28, 28), jnp.float32)   # NCHW
    params = init_params(k_p, num_features=_IN_FEATURES, num_classes=10)

    out = digit_classifier_forward(x, params, num_classes=10)
    jax.block_until_ready(out)

    assert out.shape == (2, 10), out.shape
    assert out.dtype == jnp.float32
    assert bool(jnp.all(jnp.isfinite(out)))
    print("KERNEL_OK")
</pallas_src>

<mosaic_0001>
module attributes {stable_mosaic.version = 11 : i64} {
  func.func @_mlp_kernel(%arg0: i32, %arg1: memref<8x784xbf16, #tpu.memory_space<vmem>>, %arg2: memref<784x128xbf16, #tpu.memory_space<vmem>>, %arg3: memref<1x128xf32, #tpu.memory_space<vmem>>, %arg4: memref<128x64xbf16, #tpu.memory_space<vmem>>, %arg5: memref<1x64xf32, #tpu.memory_space<vmem>>, %arg6: memref<64x128xbf16, #tpu.memory_space<vmem>>, %arg7: memref<1x128xf32, #tpu.memory_space<vmem>>, %arg8: memref<8x128xf32, #tpu.memory_space<vmem>>) attributes {dimension_semantics = [#tpu.dimension_semantics<parallel>], iteration_bounds = array<i64: 1>, scalar_prefetch = 0 : i64, scratch_operands = 0 : i64, tpu.core_type = #tpu.core_type<tc>, window_params = [{transform_indices = @transform_0, window_bounds = array<i64: 8, 784>}, {pipeline_mode = #tpu.pipeline_mode<synchronous>, transform_indices = @transform_1, window_bounds = array<i64: 784, 128>}, {pipeline_mode = #tpu.pipeline_mode<synchronous>, transform_indices = @transform_2, window_bounds = array<i64: 1, 128>}, {pipeline_mode = #tpu.pipeline_mode<synchronous>, transform_indices = @transform_3, window_bounds = array<i64: 128, 64>}, {pipeline_mode = #tpu.pipeline_mode<synchronous>, transform_indices = @transform_4, window_bounds = array<i64: 1, 64>}, {pipeline_mode = #tpu.pipeline_mode<synchronous>, transform_indices = @transform_5, window_bounds = array<i64: 64, 128>}, {pipeline_mode = #tpu.pipeline_mode<synchronous>, transform_indices = @transform_6, window_bounds = array<i64: 1, 128>}, {transform_indices = @transform_7, window_bounds = array<i64: 8, 128>}]} {
    %c0 = arith.constant 0 : index
    %c0_0 = arith.constant 0 : index
    %0 = vector.load %arg1[%c0, %c0_0] : memref<8x784xbf16, #tpu.memory_space<vmem>>, vector<8x784xbf16>
    %c0_1 = arith.constant 0 : index
    %c0_2 = arith.constant 0 : index
    %1 = vector.load %arg2[%c0_1, %c0_2] : memref<784x128xbf16, #tpu.memory_space<vmem>>, vector<784x128xbf16>
    %cst = arith.constant dense<0.000000e+00> : vector<8x128xf32>
    %2 = tpu.matmul %0, %1, %cst {dimension_numbers = #tpu.dot_dimension_numbers<[1], [0], [0], [1], [0, 0, 1, 1], [], []>} : vector<8x784xbf16>, vector<784x128xbf16>, vector<8x128xf32> -> vector<8x128xf32>
    %c0_3 = arith.constant 0 : index
    %c0_4 = arith.constant 0 : index
    %3 = vector.load %arg3[%c0_3, %c0_4] : memref<1x128xf32, #tpu.memory_space<vmem>>, vector<1x128xf32>
    %4 = vector.broadcast %3 : vector<1x128xf32> to vector<8x128xf32>
    %5 = arith.addf %2, %4 : vector<8x128xf32>
    %6 = arith.negf %5 : vector<8x128xf32>
    %7 = math.exp %6 : vector<8x128xf32>
    %cst_5 = arith.constant 1.000000e+00 : f32
    %8 = vector.broadcast %cst_5 : f32 to vector<8x128xf32>
    %9 = arith.addf %8, %7 : vector<8x128xf32>
    %10 = arith.divf %8, %9 : vector<8x128xf32>
    %11 = arith.truncf %10 : vector<8x128xf32> to vector<8x128xbf16>
    %c0_6 = arith.constant 0 : index
    %c0_7 = arith.constant 0 : index
    %12 = vector.load %arg4[%c0_6, %c0_7] : memref<128x64xbf16, #tpu.memory_space<vmem>>, vector<128x64xbf16>
    %cst_8 = arith.constant dense<0.000000e+00> : vector<8x64xf32>
    %13 = tpu.matmul %11, %12, %cst_8 {dimension_numbers = #tpu.dot_dimension_numbers<[1], [0], [0], [1], [0, 0, 1, 1], [], []>} : vector<8x128xbf16>, vector<128x64xbf16>, vector<8x64xf32> -> vector<8x64xf32>
    %c0_9 = arith.constant 0 : index
    %c0_10 = arith.constant 0 : index
    %14 = vector.load %arg5[%c0_9, %c0_10] : memref<1x64xf32, #tpu.memory_space<vmem>>, vector<1x64xf32>
    %15 = vector.broadcast %14 : vector<1x64xf32> to vector<8x64xf32>
    %16 = arith.addf %13, %15 : vector<8x64xf32>
    %17 = arith.negf %16 : vector<8x64xf32>
    %18 = math.exp %17 : vector<8x64xf32>
    %cst_11 = arith.constant 1.000000e+00 : f32
    %19 = vector.broadcast %cst_11 : f32 to vector<8x64xf32>
    %20 = arith.addf %19, %18 : vector<8x64xf32>
    %21 = arith.divf %19, %20 : vector<8x64xf32>
    %22 = arith.truncf %21 : vector<8x64xf32> to vector<8x64xbf16>
    %c0_12 = arith.constant 0 : index
    %c0_13 = arith.constant 0 : index
    %23 = vector.load %arg6[%c0_12, %c0_13] : memref<64x128xbf16, #tpu.memory_space<vmem>>, vector<64x128xbf16>
    %cst_14 = arith.constant dense<0.000000e+00> : vector<8x128xf32>
    %24 = tpu.matmul %22, %23, %cst_14 {dimension_numbers = #tpu.dot_dimension_numbers<[1], [0], [0], [1], [0, 0, 1, 1], [], []>} : vector<8x64xbf16>, vector<64x128xbf16>, vector<8x128xf32> -> vector<8x128xf32>
    %c0_15 = arith.constant 0 : index
    %c0_16 = arith.constant 0 : index
    %25 = vector.load %arg7[%c0_15, %c0_16] : memref<1x128xf32, #tpu.memory_space<vmem>>, vector<1x128xf32>
    %26 = vector.broadcast %25 : vector<1x128xf32> to vector<8x128xf32>
    %27 = arith.addf %24, %26 : vector<8x128xf32>
    %c0_17 = arith.constant 0 : index
    %c0_18 = arith.constant 0 : index
    %28 = vector.load %arg8[%c0_17, %c0_18] : memref<8x128xf32, #tpu.memory_space<vmem>>, vector<8x128xf32>
    tpu.vector_store %arg8[%c0_17, %c0_18], %27 {strides = array<i32>} : memref<8x128xf32, #tpu.memory_space<vmem>>, vector<8x128xf32>,
    return
  }
  func.func @transform_0(%arg0: i32) -> (i32, i32) {
    %c0_i32 = arith.constant 0 : i32
    %c0_i32_0 = arith.constant 0 : i32
    return %arg0, %c0_i32 : i32, i32
  }
  func.func @transform_1(%arg0: i32) -> (i32, i32) {
    %c0_i32 = arith.constant 0 : i32
    %c0_i32_0 = arith.constant 0 : i32
    %c0_i32_1 = arith.constant 0 : i32
    return %c0_i32, %c0_i32_0 : i32, i32
  }
  func.func @transform_2(%arg0: i32) -> (i32, i32) {
    %c0_i32 = arith.constant 0 : i32
    %c0_i32_0 = arith.constant 0 : i32
    %c0_i32_1 = arith.constant 0 : i32
    return %c0_i32, %c0_i32_0 : i32, i32
  }
  func.func @transform_3(%arg0: i32) -> (i32, i32) {
    %c0_i32 = arith.constant 0 : i32
    %c0_i32_0 = arith.constant 0 : i32
    %c0_i32_1 = arith.constant 0 : i32
    return %c0_i32, %c0_i32_0 : i32, i32
  }
  func.func @transform_4(%arg0: i32) -> (i32, i32) {
    %c0_i32 = arith.constant 0 : i32
    %c0_i32_0 = arith.constant 0 : i32
    %c0_i32_1 = arith.constant 0 : i32
    return %c0_i32, %c0_i32_0 : i32, i32
  }
  func.func @transform_5(%arg0: i32) -> (i32, i32) {
    %c0_i32 = arith.constant 0 : i32
    %c0_i32_0 = arith.constant 0 : i32
    %c0_i32_1 = arith.constant 0 : i32
    return %c0_i32, %c0_i32_0 : i32, i32
  }
  func.func @transform_6(%arg0: i32) -> (i32, i32) {
    %c0_i32 = arith.constant 0 : i32
    %c0_i32_0 = arith.constant 0 : i32
    %c0_i32_1 = arith.constant 0 : i32
    return %c0_i32, %c0_i32_0 : i32, i32
  }
  func.func @transform_7(%arg0: i32) -> (i32, i32) {
    %c0_i32 = arith.constant 0 : i32
    %c0_i32_0 = arith.constant 0 : i32
    return %arg0, %c0_i32 : i32, i32
  }
}

</mosaic_0001>

<bundles_post_ra>
// kernel: digit_classifier_forward.1
= control target key start
LH: loop header
LB: loop body
LE: loop exit
PB: predicated region body
PF: predicated region fallthrough
CT: control target
= control target key end

     0   :  { %12 = vsyncpa [#allocation3], 0  ;;  %s1146_s24 = smov [#allocation2]   ;;  %s1282_s0 = inlined_call_operand.vmem [shape: bf16[8,784], index: 0, kind: input, shape index: {}]   ;;  %s1283_s1 = inlined_call_operand.hbm [shape: bf16[784,128], index: 1, kind: input, shape index: {}]   ;;  %s1284_s2 = inlined_call_operand.vmem [shape: f32[1,128], index: 2, kind: input, shape index: {}]   ;;  %s1285_s3 = inlined_call_operand.vmem [shape: bf16[128,64], index: 3, kind: input, shape index: {}]   ;;  %s1286_s4 = inlined_call_operand.vmem [shape: f32[1,64], index: 4, kind: input, shape index: {}]   ;;  %s1287_s5 = inlined_call_operand.vmem [shape: bf16[64,128], index: 5, kind: input, shape index: {}]   ;;  %s1288_s6 = inlined_call_operand.vmem [shape: f32[1,128], index: 6, kind: input, shape index: {}]   ;;  %s1289_s7 = inlined_call_operand.vmem [shape: f32[8,128], index: 7, kind: output, shape index: {}]  }
   0x1   :  { %s20_s25 = sshll.u32 %s1146_s24, 4  ;;  %s1122_s28 = scalar_lea.hbm %s1283_s1, 6272  ;;  %s21_s25 = int_to_ptr.vmem [resolvable:$true] %s20_s25 }
   0x2   :  { %p1123_p0 = scmp.ne.s32.totalorder %s1283_s1, %s1122_s28  ;;  %p1126_p1 = scmp.lt.u32.totalorder %s1122_s28, %s1283_s1 }
   0x4   :  { %p1128_p2 = pnand %p1126_p1, %p1123_p0 }
   0x6   :  { %1131 = shalt.err (!%p1128_p2)
}
   0x7   :  { %s1132_s10 = scalar_lea.vmem %s21_s25, 6272  ;;  %p1137_p4 = scmp.lt.s32.totalorder %s21_s25, %s21_s25 }
   0x8   :  { %p1133_p3 = scmp.ne.s32.totalorder %s21_s25, %s1132_s10  ;;  %p1138_p5 = scmp.lt.s32.totalorder %s1132_s10, %s1132_s10 }
   0xa   :  { %p1139_p6 = por %p1138_p5, %p1137_p4 }
   0xc   :  { %p1140_p7 = pnand %p1139_p6, %p1133_p3 }
   0xe   :  { %1143 = shalt.err (!%p1140_p7)
}
   0xf   :  { %s1147_s11 = smov 64   ;;  %s1148_s12 = smov 4  }
  0x10   :  { %26 = dma.hbm_to_vmem [thread:$0]  %s1283_s1, 6272, %s21_s25, [#allocation3], %s1147_s11, %s1147_s11, %s1148_s12  }
  0x11   :  { %1144 = dma.done.wait [#allocation3], 6272  }
  0x12   :  { %1145 = vsyncadd [#allocation3], 4294961024  ;;  %v1046_v0 = vld [vmem:[#allocation2 + $0x40] sm:$0xff]   ;;  %v1050_v4 = vld [vmem:[#allocation2 + $0x48] sm:$0xff]   ;;  %v1149_v43 = vmov 0.0   ;;  %vm1150_vm0 = vmmov 0  }
  0x13   :  { %v1047_v1 = vld [vmem:[#allocation2] sm:$0xff]   ;;  %921 = vmatprep.subr.bf16.mxu0 %v1046_v0  ;;  %v1051_v5 = vld [vmem:[#allocation2 + $0x8] sm:$0xff]   ;;  %v1054_v8 = vld [vmem:[#allocation2 + $0x50] sm:$0xff]   ;;  %vm468_vm1 = vcmask 130048   ;;  %vm796_vm2 = vcmask 523264  }
  0x14   :  { %v1048_v2 = vld [vmem:[#allocation2 + $0xc0] sm:$0xff]   ;;  %922 = vmatpush3.bf16.msra.mxu0 %v1047_v1  ;;  %v1052_v6 = vld [vmem:[#allocation2 + $0xc8] sm:$0xff]   ;;  %v1055_v9 = vld [vmem:[#allocation2 + $0x10] sm:$0xff]  }
  0x15   :  { %v1049_v3 = vld [vmem:[#allocation2 + $0x80] sm:$0xff]   ;;  %943 = vmatprep.subr.bf16.mxu1 %v1048_v2  ;;  %923 = vmatprep.subr.bf16.mxu0 %v1050_v4  ;;  %v1053_v7 = vld [vmem:[#allocation2 + $0x88] sm:$0xff]   ;;  %v1056_v10 = vld [vmem:[#allocation2 + $0xd0] sm:$0xff]  }
  0x16   :  { %944 = vmatpush3.bf16.msra.mxu1 %v1049_v3  ;;  %v1057_v11 = vld [vmem:[#allocation2 + $0x90] sm:$0xff]   ;;  %v1058_v12 = vld [vmem:[#allocation2 + $0x58] sm:$0xff]   ;;  %v1062_v16 = vld [vmem:[#allocation2 + $0x60] sm:$0xff]  }
  0x17   :  { %945 = vmatprep.subr.bf16.mxu1 %v1052_v6  ;;  %v1059_v13 = vld [vmem:[#allocation2 + $0x18] sm:$0xff]   ;;  %v1063_v17 = vld [vmem:[#allocation2 + $0x20] sm:$0xff]   ;;  %v1066_v20 = vld [vmem:[#allocation2 + $0x68] sm:$0xff]  }
  0x18   :  { %924 = vmatpush3.bf16.msra.mxu0 %v1051_v5  ;;  %v1060_v14 = vld [vmem:[#allocation2 + $0xd8] sm:$0xff]   ;;  %v1064_v18 = vld [vmem:[#allocation2 + $0xe0] sm:$0xff]   ;;  %v1067_v21 = vld [vmem:[#allocation2 + $0x28] sm:$0xff]  }
  0x19   :  { %925 = vmatprep.subr.bf16.mxu0 %v1054_v8  ;;  %v1061_v15 = vld [vmem:[#allocation2 + $0x98] sm:$0xff]   ;;  %v1065_v19 = vld [vmem:[#allocation2 + $0xa0] sm:$0xff]   ;;  %v1068_v22 = vld [vmem:[#allocation2 + $0xe8] sm:$0xff]  }
  0x1a   :  { %946 = vmatpush3.bf16.msra.mxu1 %v1053_v7  ;;  %v1069_v23 = vld [vmem:[#allocation2 + $0xa8] sm:$0xff]   ;;  %v1070_v24 = vld [vmem:[#allocation2 + $0x70] sm:$0xff]   ;;  %v1074_v28 = vld [vmem:[#allocation2 + $0x78] sm:$0xff]  }
  0x1b   :  { %947 = vmatprep.subr.bf16.mxu1 %v1056_v10  ;;  %v1071_v25 = vld [vmem:[#allocation2 + $0x30] sm:$0xff]   ;;  %v1075_v29 = vld [vmem:[#allocation2 + $0x38] sm:$0xff]   ;;  %v41_v31 = vld [vmem:[%s1282_s0] sm:$0xff] }
  0x1c   :  { %926 = vmatpush3.bf16.msra.mxu0 %v1055_v9  ;;  %v1072_v26 = vld [vmem:[#allocation2 + $0xf0] sm:$0xff]   ;;  %v1076_v30 = vld [vmem:[#allocation2 + $0xf8] sm:$0xff]   ;;  %v847_v32 = vcombine.low %v41_v31, %v41_v31  ;;  %v848_v33 = vcombine.high %v41_v31, %v41_v31  ;;  %v1080_v35 = vld [vmem:[#allocation2 + $0x140] sm:$0xff]  }
  0x1d   :  { %927 = vmatprep.subr.bf16.mxu0 %v1058_v12  ;;  %v1073_v27 = vld [vmem:[#allocation2 + $0xb0] sm:$0xff]   ;;  %v1079_v34 = vld [vmem:[#allocation2 + $0xb8] sm:$0xff]   ;;  %v42_v36 = vld [vmem:[%s1282_s0 + $0x8] sm:$0xff] }
  0x1e   :  { %948 = vmatpush3.bf16.msra.mxu1 %v1057_v11  ;;  %504 = vmatprep.mubr.bf16.mxu0 %v848_v33  ;;  %v849_v37 = vcombine.low %v42_v36, %v42_v36  ;;  %v850_v38 = vcombine.high %v42_v36, %v42_v36  ;;  %v1083_v39 = vld [vmem:[#allocation2 + $0x100] sm:$0xff]   ;;  %v1084_v40 = vld [vmem:[#allocation2 + $0x148] sm:$0xff]   ;;  %v1086_v42 = vld [vmem:[#allocation2 + $0x150] sm:$0xff]  }
  0x1f   :  { %949 = vmatprep.subr.bf16.mxu1 %v1060_v14  ;;  %v1085_v41 = vld [vmem:[#allocation2 + $0x108] sm:$0xff]   ;;  %v1087_v44 = vld [vmem:[#allocation2 + $0x110] sm:$0xff]   ;;  %v1088_v45 = vld [vmem:[#allocation2 + $0x158] sm:$0xff]  }
  0x20   :  { %928 = vmatpush3.bf16.msra.mxu0 %v1059_v13  ;;  %544 = vmatprep.mubr.bf16.mxu1 %v850_v38  ;;  %v1089_v46 = vld [vmem:[#allocation2 + $0x118] sm:$0xff]   ;;  %v1090_v47 = vld [vmem:[#allocation2 + $0x160] sm:$0xff]   ;;  %v1092_v49 = vld [vmem:[#allocation2 + $0x168] sm:$0xff]  }
  0x21   :  { %929 = vmatprep.subr.bf16.mxu0 %v1062_v16  ;;  %v1091_v48 = vld [vmem:[#allocation2 + $0x120] sm:$0xff]   ;;  %v43_v51 = vld [vmem:[%s1282_s0 + $0x10] sm:$0xff]  ;;  %v1093_v52 = vld [vmem:[#allocation2 + $0x128] sm:$0xff]  }
  0x22   :  { %950 = vmatpush3.bf16.msra.mxu1 %v1061_v15  ;;  %v1098_v50 = vld [vmem:[#allocation2 + $0x180] sm:$0xff]   ;;  %v852_v53 = vcombine.high %v43_v51, %v43_v51  ;;  %v1101_v54 = vld [vmem:[%s1282_s0 + $0x18] ss:$0 sps:$4 sm:$0xff]   ;;  %v1094_v55 = vld [vmem:[#allocation2 + $0x170] sm:$0xff]   ;;  %v851_v59 = vcombine.low %v43_v51, %v43_v51 }
  0x23   :  { %951 = vmatprep.subr.bf16.mxu1 %v1064_v18  ;;  %v1095_v56 = vld [vmem:[#allocation2 + $0x130] sm:$0xff]   ;;  %v1096_v57 = vld [vmem:[#allocation2 + $0x178] sm:$0xff]   ;;  %v1102_v60 = vld [vmem:[%s1285_s3] sm:$0xff]  }
  0x24   :  { %930 = vmatpush3.bf16.msra.mxu0 %v1063_v17  ;;  %v1097_v58 = vld [vmem:[#allocation2 + $0x138] sm:$0xff]   ;;  %v1103_v61 = vld [vmem:[%s1285_s3 + $0x8] sm:$0xff]   ;;  %v1104_v62 = vld [vmem:[%s1285_s3 + $0x10] sm:$0xff]  }
  0x25   :  { %931 = vmatprep.subr.bf16.mxu0 %v1066_v20  ;;  %v1105_v63 = vld [vmem:[%s1285_s3 + $0x18] sm:$0xff]   ;;  %v1106_v0 = vld [vmem:[%s1285_s3 + $0x20] sm:$0xff]   ;;  %v1107_v1 = vld [vmem:[%s1285_s3 + $0x28] sm:$0xff]  }
  0x26   :  { %952 = vmatpush3.bf16.msra.mxu1 %v1065_v19  ;;  %v1108_v2 = vld [vmem:[%s1285_s3 + $0x30] sm:$0xff]   ;;  %v1109_v3 = vld [vmem:[%s1285_s3 + $0x38] sm:$0xff]   ;;  %v846_v5 = vld [vmem:[%s1284_s2] ss:$0 sm:$0xff] }
  0x27   :  { %953 = vmatprep.subr.bf16.mxu1 %v1068_v22  ;;  %v1110_v33 = vld [vmem:[%s1287_s5] sm:$0xff]   ;;  %v1113_v36 = vld [vmem:[%s1287_s5 + $0x18] sm:$0xff]  }
  0x28   :  { %932 = vmatpush3.bf16.msra.mxu0 %v1067_v21 }
  0x29   :  { %933 = vmatprep.subr.bf16.mxu0 %v1070_v24 }
  0x2a   :  { %954 = vmatpush3.bf16.msra.mxu1 %v1069_v23 }
  0x2b   :  { %955 = vmatprep.subr.bf16.mxu1 %v1072_v26 }
  0x2c   :  { %934 = vmatpush3.bf16.msra.mxu0 %v1071_v25 }
  0x2d   :  { %935 = vmatprep.subr.bf16.mxu0 %v1074_v28 }
  0x2e   :  { %956 = vmatpush3.bf16.msra.mxu1 %v1073_v27 }
  0x2f   :  { %957 = vmatprep.subr.bf16.mxu1 %v1076_v30 }
  0x30   :  { %936 = vmatpush3.bf16.msra.mxu0 %v1075_v29 }
  0x31   :  { %965 = vmatprep.subr.bf16.mxu0 %v1080_v35  ;;  %v1112_v35 = vld [vmem:[%s1287_s5 + $0x10] sm:$0xff]  }
  0x32   :  { %958 = vmatpush3.bf16.msra.mxu1 %v1079_v34  ;;  %v1111_v34 = vld [vmem:[%s1287_s5 + $0x8] sm:$0xff]  }
  0x33   :  { %505 = vmatmul.mubr.bf16.vlgmr.msra.gmra.mrb[0].mxu0 %v847_v32  ;;  %1003 = vmatprep.subr.bf16.mxu1 %v1149_v43 }
  0x34   :  { %966 = vmatpush3.bf16.msra.mxu0 %v1083_v39  ;;  %584 = vmatprep.mubr.bf16.mxu0 %v852_v53 }
  0x35   :  { %545 = vmatmul.mubr.bf16.vlgmr.msra.gmra.mrb[0].mxu1 %v849_v37  ;;  %967 = vmatprep.subr.bf16.mxu0 %v1084_v40  ;;  %v905_v37 = vld [vmem:[%s1286_s4] ss:$0 sm:$0xff] }
  0x36   :  { %1005 = vmatprep.mubr.msk.bf16.mxu1 %vm1150_vm0, %v1149_v43  ;;  %1004 = vmatpush3.bf16.msra.mxu1 %v1098_v50 }
  0x37   :  { %1009 = vmatprep.subr.bf16.mxu1 %v1149_v43 }
  0x38   :  { %968 = vmatpush3.bf16.msra.mxu0 %v1085_v41 }
  0x39   :  { %969 = vmatprep.subr.bf16.mxu0 %v1086_v42 }
  0x3c   :  { %970 = vmatpush3.bf16.msra.mxu0 %v1087_v44 }
  0x3d   :  { %971 = vmatprep.subr.bf16.mxu0 %v1088_v45  ;;  %1006 = vmatmul.mubr.msk.bf16.vlgmr.msra.gmra.mrb[4].mxu1 %vm468_vm1, %v1101_v54 }
  0x3e   :  { %1025 = vmatprep.mubr.msk.bf16.mxu1 %vm1150_vm0, %v1149_v43  ;;  %1010 = vmatpush3.bf16.msra.mxu1 %v1102_v60 }
  0x3f   :  { %1011 = vmatprep.subr.bf16.mxu1 %v1149_v43 }
  0x40   :  { %972 = vmatpush3.bf16.msra.mxu0 %v1089_v46 }
  0x41   :  { %973 = vmatprep.subr.bf16.mxu0 %v1090_v47 }
  0x42   :  { %1012 = vmatpush3.bf16.msra.mxu1 %v1103_v61 }
  0x43   :  { %1013 = vmatprep.subr.bf16.mxu1 %v1149_v43 }
  0x44   :  { %974 = vmatpush3.bf16.msra.mxu0 %v1091_v48  ;;  %v915_v48 = vld [vmem:[%s1288_s6] ss:$0 sm:$0xff] }
  0x45   :  { %975 = vmatprep.subr.bf16.mxu0 %v1092_v49 }
  0x46   :  { %1014 = vmatpush3.bf16.msra.mxu1 %v1104_v62 }
  0x47   :  { %1015 = vmatprep.subr.bf16.mxu1 %v1149_v43 }
  0x48   :  { %976 = vmatpush3.bf16.msra.mxu0 %v1093_v52 }
  0x49   :  { %977 = vmatprep.subr.bf16.mxu0 %v1094_v55 }
  0x4a   :  { %1016 = vmatpush3.bf16.msra.mxu1 %v1105_v63 }
  0x4b   :  { %1017 = vmatprep.subr.bf16.mxu1 %v1149_v43 }
  0x4c   :  { %978 = vmatpush3.bf16.msra.mxu0 %v1095_v56 }
  0x4d   :  { %979 = vmatprep.subr.bf16.mxu0 %v1096_v57 }
  0x4e   :  { %1018 = vmatpush3.bf16.msra.mxu1 %v1106_v0 }
  0x4f   :  { %1019 = vmatprep.subr.bf16.mxu1 %v1149_v43 }
  0x50   :  { %980 = vmatpush3.bf16.msra.mxu0 %v1097_v58 }
  0x51   :  { %1029 = vmatprep.subr.bf16.mxu0 %v1149_v43 }
  0x52   :  { %1020 = vmatpush3.bf16.msra.mxu1 %v1107_v1 }
  0x53   :  { %585 = vmatmul.mubr.bf16.vlgmr.msra.gmra.mrb[4].mxu0 %v851_v59  ;;  %1021 = vmatprep.subr.bf16.mxu1 %v1149_v43 }
  0x54   :  { %1037 = vmatprep.mubr.msk.bf16.mxu0 %vm1150_vm0, %v1149_v43  ;;  %1030 = vmatpush3.bf16.msra.mxu0 %v1110_v33 }
  0x55   :  { %1031 = vmatprep.subr.bf16.mxu0 %v1149_v43 }
  0x56   :  { %1022 = vmatpush3.bf16.msra.mxu1 %v1108_v2 }
  0x57   :  { %1023 = vmatprep.subr.bf16.mxu1 %v1149_v43 }
  0x58   :  { %1032 = vmatpush3.bf16.msra.mxu0 %v1111_v34 }
  0x59   :  { %1033 = vmatprep.subr.bf16.mxu0 %v1149_v43 }
  0x5a   :  { %1024 = vmatpush3.bf16.msra.mxu1 %v1109_v3 }
  0x5c   :  { %1034 = vmatpush3.bf16.msra.mxu0 %v1112_v35 }
  0x5d   :  { %1035 = vmatprep.subr.bf16.mxu0 %v1149_v43 }
  0x60   :  { %1036 = vmatpush3.bf16.msra.mxu0 %v1113_v36 }
 0x106   :  { %v937_v4 = vpop.f32.mrb[0].mxu0 }
 0x107   :  { %v938_v6 = vpop.f32.mrb[1].mxu0 }
 0x108   :  { %v939_v7 = vadd.f32 %v938_v6, %v937_v4  ;;  %v940_v8 = vpop.f32.mrb[2].mxu0  ;;  %v959_v9 = vpop.f32.mrb[0].mxu1 }
 0x109   :  { %v941_v10 = vpop.f32.mrb[3].mxu0  ;;  %v960_v11 = vpop.f32.mrb[1].mxu1 }
 0x10a   :  { %v507_v12 = vadd.f32 %v939_v7, %v846_v5  ;;  %v961_v13 = vadd.f32 %v960_v11, %v959_v9  ;;  %v962_v14 = vpop.f32.mrb[2].mxu1 }
 0x10b   :  { %v963_v15 = vpop.f32.mrb[3].mxu1 }
 0x10c   :  { %v547_v16 = vadd.f32 %v961_v13, %v507_v12 }
 0x110   :  { %v626_v17 = vpop.f32.mrb[4].mxu1 }
 0x111   :  { %v1007_v18 = vpop.f32.mrb[5].mxu1 }
 0x112   :  { %v629_v19 = vpop.f32.mrb[6].mxu1 }
 0x113   :  { %v1008_v20 = vpop.f32.mrb[7].mxu1 }
 0x126   :  { %v981_v21 = vpop.f32.mrb[4].mxu0 }
 0x127   :  { %v982_v22 = vpop.f32.mrb[5].mxu0 }
 0x128   :  { %v983_v23 = vadd.f32 %v982_v22, %v981_v21  ;;  %v984_v24 = vpop.f32.mrb[6].mxu0 }
 0x129   :  { %v985_v25 = vpop.f32.mrb[7].mxu0 }
 0x12a   :  { %v587_v26 = vadd.f32 %v983_v23, %v547_v16 }
 0x12c   :  { %v627_v27 = vadd.f32 %v626_v17, %v587_v26 }
 0x12e   :  { %v904_v28 = vmul.f32 -1.442695, %v627_v27 }
 0x130   :  { %1114 = vpow2.f32 %v904_v28 }
 0x13a   :  { %v1115_v29 = vpop.eup %1114 }
 0x13b   :  { %v635_v30 = vadd.f32 1.0, %v1115_v29 }
 0x13d   :  { %1116 = vrcp.f32 %v635_v30 }
 0x147   :  { %v1117_v31 = vpop.eup %1116 }
 0x148   :  { %v638_v32 = vpack.c.bf16 %v1117_v31, %v1117_v31 }
 0x14a   :  { %1026 = vmatmul.mubr.bf16.vlgmr.msra.gmra.mrb[8].mxu1 %v638_v32 }
 0x21d   :  { %v744_v38 = vpop.f32.mrb[8].mxu1 }
 0x21e   :  { %v745_v39 = vadd.f32 %v905_v37, %v744_v38  ;;  %v1027_v40 = vpop.f32.mrb[9].mxu1 }
 0x21f   :  { %v747_v41 = vpop.f32.mrb[10].mxu1 }
 0x220   :  { %v914_v42 = vmul.f32 -1.442695, %v745_v39  ;;  %v1028_v44 = vpop.f32.mrb[11].mxu1 }
 0x222   :  { %1118 = vpow2.f32 %v914_v42 }
 0x22c   :  { %v1119_v45 = vpop.eup %1118 }
 0x22d   :  { %v753_v46 = vadd.f32 1.0, %v1119_v45 }
 0x22f   :  { %1120 = vrcp.f32 %v753_v46 }
 0x239   :  { %v1121_v43 = vpop.eup %1120 }
 0x23a   :  { %v756_v47 = vpack.c.bf16 %v1121_v43, %v1121_v43 }
 0x23c   :  { %1038 = vmatmul.mubr.msk.bf16.vlgmr.msra.gmra.mrb[8].mxu0 %vm796_vm2, %v756_v47 }
 0x30f   :  { %v834_v49 = vpop.f32.mrb[8].mxu0 }
 0x310   :  { %v835_v50 = vadd.f32 %v915_v48, %v834_v49  ;;  %v1039_v51 = vpop.f32.mrb[9].mxu0 }
 0x311   :  { %v837_v52 = vpop.f32.mrb[10].mxu0 }
 0x312   :  { %840 = vst [vmem:[%s1289_s7] sm:$0xff] %v835_v50  ;;  %v1040_v53 = vpop.f32.mrb[11].mxu0 }
 0x313   :  { %845 = vsyncpa [#allocation3], 1 }

</bundles_post_ra>
